<compile_context>
chip_gen: v6e
topology: v6e:2x2x1
jax: 0.10.0
libtpu: 0.0.40
codegen_flags: <defaults>
</compile_context>

<pallas_src>
import jax
import jax.numpy as jnp
from jax import lax
from jax.experimental import pallas as pl
from jax.experimental.pallas import tpu as pltpu

EPSILON = 1e-10


def _discriminator_kernel(x_ref, hidden_ref, cnt_ref, w_ref, b_ref, out_ref,
                          sum_acc):
    # x_ref:      [TB, TS]    int32 token ids (lane-dense seq tile)
    # hidden_ref: [TB, TS, E] f32/bf16 encoder hidden states (seq tile)
    # cnt_ref:    [TB, 1]     f32 per-row non-pad token counts (precomputed)
    # w_ref:      [C, E]      f32 classifier weight
    # b_ref:      [1, C]      f32 classifier bias
    # out_ref:    [TB, C]     f32 log-probs (resident across the seq axis)
    # sum_acc:    [TB, 1, E]  f32 scratch (masked sum over seq)
    seq_idx = pl.program_id(1)

    @pl.when(seq_idx == 0)
    def _():
        sum_acc[...] = jnp.zeros_like(sum_acc)

    # 0/1 mask in the hidden dtype so bf16 hidden streams straight into the
    # MXU with no in-VMEM f32 upcast copy (products vs 0/1 are exact).
    mask = (x_ref[...] != 0).astype(hidden_ref.dtype)[:, None, :]   # [TB,1,TS]
    # Batched MXU contraction over the seq axis, f32 accumulation:
    #   [TB,1,TS] @ [TB,TS,E] -> [TB,1,E]
    sum_acc[...] += jnp.einsum(
        "bqs,bse->bqe", mask, hidden_ref[...],
        preferred_element_type=jnp.float32)

    @pl.when(seq_idx == pl.num_programs(1) - 1)
    def _():
        total = sum_acc[...]                                        # [TB,1,E]
        avg = total[:, 0, :] / (cnt_ref[...] + EPSILON)             # [TB, E]
        # logits = avg @ W.T + b, contracting last dims directly (no in-kernel
        # transpose of W).
        logits = lax.dot_general(
            avg, w_ref[...],
            dimension_numbers=(((1,), (1,)), ((), ())),
            preferred_element_type=jnp.float32) + b_ref[...]        # [TB, C]
        m = jnp.max(logits, axis=-1, keepdims=True)
        shifted = logits - m
        lse = jnp.log(jnp.sum(jnp.exp(shifted), axis=-1, keepdims=True))
        out_ref[...] = shifted - lse


def _round_up(v, m):
    return ((v + m - 1) // m) * m


def _vmem_capacity_bytes():
    try:
        info = pltpu.get_tpu_info()
        cap = getattr(info, "vmem_capacity_bytes", None)
        if cap:
            return int(cap)
    except Exception:
        pass
    return 64 * 1024 * 1024  # conservative fallback: v7x per-TensorCore VMEM


def discriminator_forward(x_tokens, hidden, w_cls, b_cls, *,
                          block_b=8, block_s=None):
    """x_tokens: [B, S] int32; hidden: [B, S, E] f32/bf16;
    w_cls: [C, E] f32; b_cls: [1, C] f32  ->  [B, C] f32 log-probs."""
    B, S = x_tokens.shape
    _, _, E = hidden.shape
    C = w_cls.shape[0]

    vmem_cap = _vmem_capacity_bytes()
    h_item = jnp.dtype(hidden.dtype).itemsize

    if block_s is None:
        # Generation-aware seq tile: bigger on 128 MiB parts (v5e/v6e),
        # conservative on v7x's 64 MiB; 2x when hidden is bf16.
        base = 1024 if vmem_cap >= 100 * 1024 * 1024 else 512
        block_s = base * (2 if h_item <= 2 else 1)

    # Batch tile: sublane dim of the x block -> multiple of 8, or the full
    # (small) batch.  With the "parallel" batch axis, grid[0] >= 2 whenever
    # B >= 2*block_b, so both v7x TensorCores are used at real batch sizes.
    block_b = max(8, (block_b // 8) * 8)
    if B >= block_b:
        tb = block_b
        b_pad = _round_up(B, tb)
    else:
        tb = B
        b_pad = B

    # Seq tile: lane dim of the x block -> multiple of 128, or the whole
    # (8-aligned) sequence when it is short.
    if S > block_s:
        ts = max(128, (block_s // 128) * 128)
        s_pad = _round_up(S, ts)
    else:
        ts = _round_up(S, 8)
        s_pad = ts

    # Per-row non-pad token counts, computed once in XLA from the raw tokens.
    cnt = jnp.sum(x_tokens != 0, axis=1, keepdims=True).astype(jnp.float32)

    x2 = x_tokens.astype(jnp.int32)
    if (b_pad, s_pad) != (B, S):
        # Pad with token id 0 (= pad token, masked out) and zero hidden rows;
        # counts come from the unpadded tokens, so numerics are unchanged.
        x2 = jnp.pad(x2, ((0, b_pad - B), (0, s_pad - S)))
        hidden = jnp.pad(hidden, ((0, b_pad - B), (0, s_pad - S), (0, 0)))
        cnt = jnp.pad(cnt, ((0, b_pad - B), (0, 0)))

    grid = (b_pad // tb, s_pad // ts)

    # Explicit VMEM budget (padded shapes, double-buffered pipeline inputs),
    # clamped to ~85% of this generation's physical per-core VMEM.
    est = (2 * tb * ts * E * h_item                                  # hidden
           + 2 * _round_up(tb, 8) * _round_up(ts, 128) * 4           # x
           + 2 * _round_up(tb, 8) * 128 * 4                          # cnt
           + _round_up(C, 8) * _round_up(E, 128) * 4                 # W
           + 8 * _round_up(C, 128) * 4                               # b
           + 2 * _round_up(tb, 8) * _round_up(C, 128) * 4            # out
           + tb * 8 * _round_up(E, 128) * 4)                         # sum_acc
    vmem_limit = int(min(max(int(1.5 * est) + (4 << 20), 32 << 20),
                         int(0.85 * vmem_cap)))

    out = pl.pallas_call(
        _discriminator_kernel,
        out_shape=jax.ShapeDtypeStruct((b_pad, C), jnp.float32),
        grid_spec=pltpu.PrefetchScalarGridSpec(
            num_scalar_prefetch=0,
            grid=grid,
            in_specs=[
                pl.BlockSpec((tb, ts), lambda i, j: (i, j)),
                pl.BlockSpec((tb, ts, E), lambda i, j: (i, j, 0)),
                pl.BlockSpec((tb, 1), lambda i, j: (i, 0)),
                pl.BlockSpec((C, E), lambda i, j: (0, 0)),
                pl.BlockSpec((1, C), lambda i, j: (0, 0)),
            ],
            out_specs=pl.BlockSpec((tb, C), lambda i, j: (i, 0)),
            scratch_shapes=[pltpu.VMEM((tb, 1, E), jnp.float32)],
        ),
        compiler_params=pltpu.CompilerParams(
            dimension_semantics=("parallel", "arbitrary"),
            vmem_limit_bytes=vmem_limit,
        ),
    )(x2, hidden, cnt, w_cls, b_cls)

    return out[:B]


def synthetic_encoder(x_tokens, embed_table):
    # TODO(synk): the GPT-2 transformer encoder (last_hidden_state) is not
    # reimplemented here; a deterministic token-embedding lookup stands in.
    return embed_table[x_tokens]  # [B, S, E]


def reference_forward(x_tokens, hidden, w_cls, b_cls):
    mask = (x_tokens != 0).astype(jnp.float32)[:, :, None]
    mask = jnp.broadcast_to(mask, hidden.shape)
    hidden_f32 = hidden.astype(jnp.float32)
    avg = (jnp.sum(hidden_f32 * mask, axis=1)
           / (jnp.sum(mask, axis=1) + EPSILON))
    logits = avg @ w_cls.T + b_cls[0]
    return jax.nn.log_softmax(logits, axis=-1)


if __name__ == "__main__":
    key = jax.random.PRNGKey(0)
    k_tok, k_emb, k_w, k_b = jax.random.split(key, 4)

    # Small shapes; token id 0 acts as padding (masked out), as in PyTorch.
    B, S, E, C = 16, 256, 128, 8
    VOCAB = 64

    x_tokens = jax.random.randint(k_tok, (B, S), 0, VOCAB, dtype=jnp.int32)
    embed_table = jax.random.normal(k_emb, (VOCAB, E), dtype=jnp.float32) * 0.1
    w_cls = jax.random.normal(k_w, (C, E), dtype=jnp.float32) * 0.05
    b_cls = jax.random.normal(k_b, (1, C), dtype=jnp.float32) * 0.01

    hidden = synthetic_encoder(x_tokens, embed_table)  # [B, S, E] f32

    # Small tiles so the (batch, seq) streaming grid + accumulator path is
    # exercised: grid = (16//8, 256//128) = (2, 2).
    out = discriminator_forward(x_tokens, hidden, w_cls, b_cls,
                                block_b=8, block_s=128)
    out = jax.block_until_ready(out)
    ref = reference_forward(x_tokens, hidden, w_cls, b_cls)
    assert out.shape == (B, C)
    assert jnp.allclose(out, ref, atol=1e-3, rtol=1e-3), "f32 mismatch vs reference"

    # bf16 streaming path (halves the dominant HBM read; products against the
    # 0/1 mask are exact and accumulation stays f32).
    hidden_bf16 = hidden.astype(jnp.bfloat16)
    out_bf = discriminator_forward(x_tokens, hidden_bf16, w_cls, b_cls,
                                   block_b=8, block_s=128)
    out_bf = jax.block_until_ready(out_bf)
    ref_bf = reference_forward(x_tokens, hidden_bf16, w_cls, b_cls)
    assert jnp.allclose(out_bf, ref_bf, atol=2e-3, rtol=2e-3), "bf16 mismatch vs reference"

    print("KERNEL_OK")
</pallas_src>

<mosaic_0001>
module attributes {stable_mosaic.version = 11 : i64} {
  func.func @_discriminator_kernel(%arg0: i32, %arg1: i32, %arg2: memref<8x128xi32, #tpu.memory_space<vmem>>, %arg3: memref<8x128x128xf32, #tpu.memory_space<vmem>>, %arg4: memref<8x1xf32, #tpu.memory_space<vmem>>, %arg5: memref<8x128xf32, #tpu.memory_space<vmem>>, %arg6: memref<1x8xf32, #tpu.memory_space<vmem>>, %arg7: memref<8x8xf32, #tpu.memory_space<vmem>>, %arg8: memref<8x1x128xf32, #tpu.memory_space<vmem>>) attributes {dimension_semantics = [#tpu.dimension_semantics<parallel>, #tpu.dimension_semantics<arbitrary>], iteration_bounds = array<i64: 2, 2>, scalar_prefetch = 0 : i64, scratch_operands = 1 : i64, tpu.core_type = #tpu.core_type<tc>, window_params = [{transform_indices = @transform_0, window_bounds = array<i64: 8, 128>}, {transform_indices = @transform_1, window_bounds = array<i64: 8, 128, 128>}, {transform_indices = @transform_2, window_bounds = array<i64: 8, 1>}, {pipeline_mode = #tpu.pipeline_mode<synchronous>, transform_indices = @transform_3, window_bounds = array<i64: 8, 128>}, {pipeline_mode = #tpu.pipeline_mode<synchronous>, transform_indices = @transform_4, window_bounds = array<i64: 1, 8>}, {transform_indices = @transform_5, window_bounds = array<i64: 8, 8>}]} {
    %c0_i32 = arith.constant 0 : i32
    %0 = arith.cmpi eq, %arg1, %c0_i32 : i32
    %1 = arith.extui %0 : i1 to i32
    %c0_i32_0 = arith.constant 0 : i32
    %2 = arith.cmpi ne, %1, %c0_i32_0 : i32
    scf.if %2 {
      %cst_13 = arith.constant 0.000000e+00 : f32
      %17 = vector.broadcast %cst_13 : f32 to vector<8x1x128xf32>
      %c0_14 = arith.constant 0 : index
      %c0_15 = arith.constant 0 : index
      %c0_16 = arith.constant 0 : index
      %18 = vector.load %arg8[%c0_14, %c0_15, %c0_16] : memref<8x1x128xf32, #tpu.memory_space<vmem>>, vector<8x1x128xf32>
      tpu.vector_store %arg8[%c0_14, %c0_15, %c0_16], %17 {strides = array<i32>} : memref<8x1x128xf32, #tpu.memory_space<vmem>>, vector<8x1x128xf32>,
    } else {
    }
    %c0 = arith.constant 0 : index
    %c0_1 = arith.constant 0 : index
    %3 = vector.load %arg2[%c0, %c0_1] : memref<8x128xi32, #tpu.memory_space<vmem>>, vector<8x128xi32>
    %c0_i32_2 = arith.constant 0 : i32
    %4 = vector.broadcast %c0_i32_2 : i32 to vector<8x128xi32>
    %5 = arith.cmpi ne, %3, %4 : vector<8x128xi32>
    %6 = arith.extui %5 : vector<8x128xi1> to vector<8x128xi32>
    %7 = arith.sitofp %6 : vector<8x128xi32> to vector<8x128xf32>
    %8 = vector.shape_cast %7 : vector<8x128xf32> to vector<8x1x128xf32>
    %c0_3 = arith.constant 0 : index
    %c0_4 = arith.constant 0 : index
    %c0_5 = arith.constant 0 : index
    %9 = vector.load %arg8[%c0_3, %c0_4, %c0_5] : memref<8x1x128xf32, #tpu.memory_space<vmem>>, vector<8x1x128xf32>
    %c0_6 = arith.constant 0 : index
    %c0_7 = arith.constant 0 : index
    %c0_8 = arith.constant 0 : index
    %10 = vector.load %arg3[%c0_6, %c0_7, %c0_8] : memref<8x128x128xf32, #tpu.memory_space<vmem>>, vector<8x128x128xf32>
    "tpu.trace_start"() <{level = 10 : i32, message = "bqs,bse->bqe"}> : () -> ()
    %cst = arith.constant dense<0.000000e+00> : vector<8x1x128xf32>
    %11 = tpu.matmul %8, %10, %cst {dimension_numbers = #tpu.dot_dimension_numbers<[2], [1], [1], [2], [0, 0, 0, 1, 1, 2], [0], [0]>} : vector<8x1x128xf32>, vector<8x128x128xf32>, vector<8x1x128xf32> -> vector<8x1x128xf32>
    "tpu.trace_stop"() : () -> ()
    %12 = arith.addf %9, %11 : vector<8x1x128xf32>
    %c0_9 = arith.constant 0 : index
    %c0_10 = arith.constant 0 : index
    %c0_11 = arith.constant 0 : index
    %13 = vector.load %arg8[%c0_9, %c0_10, %c0_11] : memref<8x1x128xf32, #tpu.memory_space<vmem>>, vector<8x1x128xf32>
    tpu.vector_store %arg8[%c0_9, %c0_10, %c0_11], %12 {strides = array<i32>} : memref<8x1x128xf32, #tpu.memory_space<vmem>>, vector<8x1x128xf32>,
    %c1_i32 = arith.constant 1 : i32
    %14 = arith.cmpi eq, %arg1, %c1_i32 : i32
    %15 = arith.extui %14 : i1 to i32
    %c0_i32_12 = arith.constant 0 : i32
    %16 = arith.cmpi ne, %15, %c0_i32_12 : i32
    scf.if %16 {
      %c0_13 = arith.constant 0 : index
      %c0_14 = arith.constant 0 : index
      %c0_15 = arith.constant 0 : index
      %17 = vector.load %arg8[%c0_13, %c0_14, %c0_15] : memref<8x1x128xf32, #tpu.memory_space<vmem>>, vector<8x1x128xf32>
      %18 = vector.shape_cast %17 : vector<8x1x128xf32> to vector<8x128xf32>
      %c0_16 = arith.constant 0 : index
      %c0_17 = arith.constant 0 : index
      %19 = vector.load %arg4[%c0_16, %c0_17] : memref<8x1xf32, #tpu.memory_space<vmem>>, vector<8x1xf32>
      %cst_18 = arith.constant 1.000000e-10 : f32
      %20 = vector.broadcast %cst_18 : f32 to vector<8x1xf32>
      %21 = arith.addf %19, %20 : vector<8x1xf32>
      %22 = vector.broadcast %21 : vector<8x1xf32> to vector<8x128xf32>
      %23 = arith.divf %18, %22 : vector<8x128xf32>
      %c0_19 = arith.constant 0 : index
      %c0_20 = arith.constant 0 : index
      %24 = vector.load %arg5[%c0_19, %c0_20] : memref<8x128xf32, #tpu.memory_space<vmem>>, vector<8x128xf32>
      %cst_21 = arith.constant dense<0.000000e+00> : vector<8x8xf32>
      %25 = tpu.matmul %23, %24, %cst_21 {dimension_numbers = #tpu.dot_dimension_numbers<[1], [1], [0], [0], [0, 0, 1, 0], [], []>} : vector<8x128xf32>, vector<8x128xf32>, vector<8x8xf32> -> vector<8x8xf32>
      %c0_22 = arith.constant 0 : index
      %c0_23 = arith.constant 0 : index
      %26 = vector.load %arg6[%c0_22, %c0_23] : memref<1x8xf32, #tpu.memory_space<vmem>>, vector<1x8xf32>
      %27 = vector.broadcast %26 : vector<1x8xf32> to vector<8x8xf32>
      %28 = arith.addf %25, %27 : vector<8x8xf32>
      %cst_24 = arith.constant dense<0xFF800000> : vector<8xf32>
      %29 = vector.multi_reduction <maximumf>, %28, %cst_24 [1] : vector<8x8xf32> to vector<8xf32>
      %30 = vector.shape_cast %29 : vector<8xf32> to vector<8x1xf32>
      %31 = vector.broadcast %30 : vector<8x1xf32> to vector<8x8xf32>
      %32 = arith.subf %28, %31 : vector<8x8xf32>
      %33 = math.exp %32 : vector<8x8xf32>
      %cst_25 = arith.constant dense<0.000000e+00> : vector<8xf32>
      %34 = vector.multi_reduction <add>, %33, %cst_25 [1] : vector<8x8xf32> to vector<8xf32>
      %35 = vector.shape_cast %34 : vector<8xf32> to vector<8x1xf32>
      %36 = math.log %35 : vector<8x1xf32>
      %37 = vector.broadcast %36 : vector<8x1xf32> to vector<8x8xf32>
      %38 = arith.subf %32, %37 : vector<8x8xf32>
      %c0_26 = arith.constant 0 : index
      %c0_27 = arith.constant 0 : index
      %39 = vector.load %arg7[%c0_26, %c0_27] : memref<8x8xf32, #tpu.memory_space<vmem>>, vector<8x8xf32>
      tpu.vector_store %arg7[%c0_26, %c0_27], %38 {strides = array<i32>} : memref<8x8xf32, #tpu.memory_space<vmem>>, vector<8x8xf32>,
    } else {
    }
    return
  }
  func.func @transform_0(%arg0: i32, %arg1: i32) -> (i32, i32) {
    %c0_i32 = arith.constant 0 : i32
    return %arg0, %arg1 : i32, i32
  }
  func.func @transform_1(%arg0: i32, %arg1: i32) -> (i32, i32, i32) {
    %c0_i32 = arith.constant 0 : i32
    %c0_i32_0 = arith.constant 0 : i32
    return %arg0, %arg1, %c0_i32 : i32, i32, i32
  }
  func.func @transform_2(%arg0: i32, %arg1: i32) -> (i32, i32) {
    %c0_i32 = arith.constant 0 : i32
    %c0_i32_0 = arith.constant 0 : i32
    return %arg0, %c0_i32 : i32, i32
  }
  func.func @transform_3(%arg0: i32, %arg1: i32) -> (i32, i32) {
    %c0_i32 = arith.constant 0 : i32
    %c0_i32_0 = arith.constant 0 : i32
    %c0_i32_1 = arith.constant 0 : i32
    return %c0_i32, %c0_i32_0 : i32, i32
  }
  func.func @transform_4(%arg0: i32, %arg1: i32) -> (i32, i32) {
    %c0_i32 = arith.constant 0 : i32
    %c0_i32_0 = arith.constant 0 : i32
    %c0_i32_1 = arith.constant 0 : i32
    return %c0_i32, %c0_i32_0 : i32, i32
  }
  func.func @transform_5(%arg0: i32, %arg1: i32) -> (i32, i32) {
    %c0_i32 = arith.constant 0 : i32
    %c0_i32_0 = arith.constant 0 : i32
    return %arg0, %c0_i32 : i32, i32
  }
}

</mosaic_0001>

<bundles_post_ra>
// kernel: tpu_custom_call.1
= control target key start
LH: loop header
LB: loop body
LE: loop exit
PB: predicated region body
PF: predicated region fallthrough
CT: control target
= control target key end

     0   :  { %s2833_s0 = inlined_call_operand.hbm [shape: s32[16,256], index: 0, kind: input, shape index: {}]   ;;  %s2834_s1 = inlined_call_operand.hbm [shape: f32[16,256,128], index: 1, kind: input, shape index: {}]   ;;  %s2835_s2 = inlined_call_operand.vmem [shape: f32[16,1], index: 2, kind: input, shape index: {}]   ;;  %s2836_s3 = inlined_call_operand.hbm [shape: f32[8,128], index: 3, kind: input, shape index: {}]   ;;  %s2837_s4 = inlined_call_operand.hbm [shape: f32[1,8], index: 4, kind: input, shape index: {}]   ;;  %s2838_s5 = inlined_call_operand.vmem [shape: f32[16,8], index: 5, kind: output, shape index: {}]  }
   0x1   :  { %2846 = sst [smem:[#allocation19_spill]] %s2836_s3 }
   0x2   :  { %2847 = sst [smem:[#allocation20_spill]] %s2837_s4 }
   0x3   :  { %10 = vsyncpa [#allocation4], 0 }
   0x4   :  { %12 = vsyncpa [#allocation4 + $0x1], 0 }
   0x5   :  { %13 = vsyncpa [#allocation6], 0 }
   0x6   :  { %15 = vsyncpa [#allocation6 + $0x1], 0 }
   0x7   :  { %16 = vsyncpa [#allocation9], 0  ;;  %s2302_s18 = smov 0   ;;  %s2304_s19 = smov 0  }
   0x8   :  { %s2306_s20 = smov 0   ;;  %s2308_s21 = smov 0  }
   0x9   :  { %s2310_s22 = smov 0   ;;  %s2312_s23 = smov 0  }
   0xa   :  { %s2314_s24 = smov 0   ;;  %s2316_s25 = smov 0  }
   0xb LB: > { %s2843_s26 = sadd.s32 4294967295, %s2254_s25   ;;  %s31_s27 = sadd.s32 1, %s2246_s23  ;;  %s2254_s25 = sphi %s2316_s25, %s22_s25   ;;  %s2250_s24 = sphi %s2314_s24, %s2869_s24   ;;  %s2246_s23 = sphi %s2312_s23, %s2868_s23   ;;  %s2242_s22 = sphi %s2310_s22, %s2867_s22   ;;  %s2238_s21 = sphi %s2308_s21, %s2866_s21   ;;  %s2234_s20 = sphi %s2306_s20, %s2865_s20   ;;  %s2230_s19 = sphi %s2304_s19, %s2864_s19   ;;  %s2226_s18 = sphi %s2302_s18, %s2863_s18  }
   0xc   : > { %p32_p0 = scmp.ge.s32.totalorder %s31_s27, 2  ;;  %s34_s28 = sadd.s32 1, %s2250_s24 }
   0xd   : > { %s43_s29 = sadd.s32 1, %s2234_s20  ;;  %p50_p1 = scmp.ne.s32.totalorder %s2234_s20, %s2230_s19 }
   0xe   : > { %s2871_s27 = smov (%p32_p0, %s31_s27), 0  ;;  %s2873_s28 = smov (!%p32_p0, %s34_s28), %s2250_s24 }
   0xf   : > { %2848 = sst [smem:[#allocation17_spill]] %s2871_s27  ;;  %s39_s30 = ssub.s32 %s2246_s23, %s2871_s27 }
  0x10   : > { %p51_p2 = scmp.eq.s32.totalorder %s2254_s25, 0  ;;  %p36_p3 = scmp.ge.s32.totalorder %s2873_s28, 2 }
  0x11   : > { %p56_p4 = scmp.ne.s32.totalorder %s2230_s19, %s2226_s18  ;;  %p2359_p6 = scmp.eq.s32.totalorder %s2843_s26, 0 }
  0x12   : > { %p2353_p5 = por %p51_p2, %p50_p1  ;;  %s2875_s28 = smov (%p36_p3, %s2873_s28), 0 }
  0x13   : > { %s2850_s7 = scalar_select %p2359_p6, 1, 0 }
  0x14   : > { %2851 = sst [smem:[#allocation18_spill]] %s2875_s28  ;;  %p2367_p7 = por %p2359_p6, %p56_p4 }
  0x15   : > { %p1517_p8 = scmp.ge.s32.totalorder %s2254_s25, 1  ;;  %s38_s9 = ssub.s32 %s2250_s24, %s2875_s28 }
  0x16   : > { %s2852_s8 = scalar_select %p2367_p7, 1, 0 }
  0x17   : > { %p189_p9 = scmp.lt.s32.totalorder %s2254_s25, 5  ;;  %s40_s10 = sor.u32 %s39_s30, %s38_s9 }
  0x18   : > { %p41_p10 = scmp.eq.s32.totalorder %s40_s10, 0  ;;  %s2256_s13 = smov [#allocation7]  }
  0x19   : > { %p2375_p11 = pnand %p1517_p8, %p189_p9  ;;  %s202_s14 = sshll.u32 %s2256_s13, 4  ;;  %s203_s14 = int_to_ptr.vmem [resolvable:$true] %s202_s14 }
  0x1a   : > { %s2380_s12 = scalar_select %p41_p10, %s2234_s20, %s43_s29  }
  0x1b   : > { %s2853_s11 = scalar_select %p2375_p11, 1, 0 }
  0x1c   : > { %p1987_p12 = pneg %p2375_p11  ;;  %s2257_s15 = smov [#allocation8]  }
  0x1d   : > { %s213_s16 = sshll.u32 %s2257_s15, 4  ;;  %s2109_s18 = scalar_lea.vmem %s203_s14, 128  ;;  %s214_s16 = int_to_ptr.vmem [resolvable:$true] %s213_s16 }
  0x1e   : > { %p2386_p13 = pnand %p1987_p12, %p2359_p6  ;;  %p2110_p1 = scmp.ne.s32.totalorder %s203_s14, %s2109_s18 }
  0x1f   : > { %p2117_p4 = scmp.lt.s32.totalorder %s203_s14, %s203_s14  ;;  %p2118_p8 = scmp.lt.s32.totalorder %s2109_s18, %s2109_s18 }
  0x20   : > { %p2100_p0 = pneg %p2386_p13 }
  0x21   : > { %p2119_p9 = por %p2118_p8, %p2117_p4 }
  0x22   : > { %p2112_p2 = pnand %p2110_p1, %p2100_p0 }
  0x24   : > { %p2113_p3 = pneg %p2112_p2 }
  0x26   : > { %p2120_p10 = pnand %p2119_p9, %p2113_p3 }
  0x28   : > { %2123 = shalt.err (!%p2120_p10)
}
  0x29   : > { %s2855_s3 = sld [smem:[#allocation19_spill]]  ;;  %s2135_s9 = scalar_lea.vmem %s214_s16, 16 }
  0x2a   : > { %p2136_p12 = scmp.ne.s32.totalorder %s214_s16, %s2135_s9  ;;  %s2142_s10 = scalar_lea.vmem %s214_s16, 32 }
  0x2b   : > { %p2143_p1 = scmp.lt.s32.totalorder %s214_s16, %s214_s16  ;;  %p2144_p2 = scmp.lt.s32.totalorder %s2142_s10, %s2135_s9 }
  0x2c   : > { %p2138_p6 = pnand %p2136_p12, %p2100_p0 }
  0x2d   : > { %p2145_p11 = por %p2144_p2, %p2143_p1 }
  0x2e   : > { %p2139_p7 = pneg %p2138_p6 }
  0x2f   : > { %1990 = dma.hbm_to_vmem [thread:$0]  (!%p2386_p13), %s2855_s3, 128, %s203_s14, [#allocation6]  }
  0x30   : > { %p2146_p4 = pnand %p2145_p11, %p2139_p7 }
  0x32   : > { %2149 = shalt.err (!%p2146_p4)
}
  0x33   : > { %s2856_s4 = sld [smem:[#allocation20_spill]]  ;;  %p1520_p3 = scmp.ge.s32.totalorder %s2254_s25, 4 }
  0x34   : > { %s2410_s14 = sand.u32 (!%p1520_p3), 1, %s2234_s20   ;;  %s1522_s18 = sshll.u32 (!%p1520_p3), %s2250_s24, 1 }
  0x35   : > { %220 = sbr.rel (%p1520_p3) target bundleno = 86 (0x56), region = 24  ;;  %s1521_s29 = sshll.u32 (!%p1520_p3), %s2410_s14, 3 }
  0x36   : > { %s233_s30 = sadd.s32 (!%p1520_p3), %s2246_s23, %s1522_s18  ;;  %s228_s17 = scalar_lea.vmem (!%p1520_p3), [#allocation3], %s1521_s29 }
  0x37   : > { %s1523_s9 = sshll.u32 (!%p1520_p3), %s233_s30, 7  ;;  %s237_s10 = sshll.u32 (!%p1520_p3), %s228_s17, 4  ;;  %s238_s10 = int_to_ptr.vmem [resolvable:$true] %s237_s10 }
  0x38   : > { %s225_s15 = scalar_lea.sflag (!%p1520_p3), [#allocation4], %s2410_s14  ;;  %s2162_s3 = scalar_lea.vmem (!%p1520_p3), %s238_s10, 128 }
  0x39   : > { %1993 = dma.hbm_to_vmem [thread:$0]  (!%p2386_p13), %s2856_s4, 16, %s214_s16, [#allocation9]  }
  0x3a   : > { %s235_s16 = scalar_lea.hbm %s2833_s0, %s1523_s9  ;;  %p2163_p6 = scmp.ne.s32.totalorder %s238_s10, %s2162_s3 }
  0x3b   : > { %s2258_s4 = smov [#allocation3]  }
  0x3c   : > { %p2164_p7 = pnand %p2163_p6, %p2353_p5  ;;  %s2166_s28 = sshll.u32 %s2258_s4, 4  ;;  %s2167_s28 = int_to_ptr.vmem [resolvable:$false] %s2166_s28 }
  0x3d   : > { %s2168_s27 = scalar_lea.vmem %s2167_s28, 256  ;;  %p2169_p13 = scmp.lt.s32.totalorder %s238_s10, %s2167_s28 }
  0x3e   : > { %p2165_p11 = pneg %p2164_p7  ;;  %p2170_p0 = scmp.lt.s32.totalorder %s2168_s27, %s2162_s3 }
  0x40   : > { %p2171_p8 = por %p2170_p0, %p2169_p13 }
  0x42   : > { %p2172_p9 = pnand %p2171_p8, %p2165_p11 }
  0x44   : > { %2175 = shalt.err (!%p2172_p9)
}
  0x45   : > { %1972 = dma.hbm_to_vmem [thread:$0]  (%p2353_p5), %s235_s16, 128, %s238_s10, %s225_s15  }
  0x46   : > { %s1524_s26 = sshll.u32 %s2410_s14, 10  ;;  %s244_s4 = sand.u32 1, %s2254_s25  }
  0x47   : > { %s1526_s18 = sshll.u32 %s2246_s23, 4  ;;  %s1544_s28 = sshll.u32 %s2250_s24, 8 }
  0x48   : > { %s255_s3 = sadd.s32 %s1544_s28, %s1526_s18  ;;  %s248_s27 = scalar_lea.vmem [#allocation5], %s1524_s26 }
  0x49   : > { %s270_s29 = sshll.u32 %s248_s27, 4  ;;  %s1528_s30 = sshll.u32 %s255_s3, 7  ;;  %s271_s29 = int_to_ptr.vmem [resolvable:$true] %s270_s29 }
  0x4a   : > { %s1973_s9 = scalar_select %p2353_p5, [#allocation0], [#allocation12] }
  0x4b   : > { %s2259_s17 = smov 4096   ;;  %s2260_s13 = smov 2048  }
  0x4c   : > { %1974 = sst [smem:[#allocation11]] (%p2353_p5), %s2259_s17  ;;  %s2261_s14 = smov 16  }
  0x4d   : > { %s262_s10 = sld [smem:[%s1973_s9]]   ;;  %s2262_s16 = smov 128  }
  0x4e   : > { %1975 = sst [smem:[#allocation11 + $0x1]] (%p2353_p5), %s2260_s13  ;;  %s257_s18 = scalar_lea.hbm %s2834_s1, %s1528_s30 }
  0x4f   : > { %1976 = sst [smem:[#allocation11 + $0x2]] (%p2353_p5), %s2261_s14  ;;  %s2263_s28 = smov 8  }
  0x50   : > { %1977 = sst [smem:[#allocation11 + $0x3]] (%p2353_p5), %s2262_s16  ;;  %s245_s9 = scalar_lea.sflag [#allocation6], %s244_s4 }
  0x51   : > { %1978 = sst [smem:[#allocation11 + $0x4]] (%p2353_p5), %s2262_s16  ;;  %s2264_s17 = smov 131072  }
  0x52   : > { %1979 = sst [smem:[#allocation11 + $0x5]] (%p2353_p5), %s2263_s28 }
  0x53   : > { %s1529_s3 = sshll.u32 %s262_s10, 26 }
  0x54   : > { %s1530_s27 = sadd.s32 134217728, %s1529_s3 }
  0x55   : > { %1980 = dma.general (%p2353_p5), %s257_s18, 16384, %s271_s29, %s245_s9, %s2264_s17, [#allocation11], %s1530_s27, 0  }
  0x56 PF: > { %p2857_p10 = scmp.ne.s32.totalorder %s2853_s11, 0 }
  0x57   : > { %s304_s13 = sand.u32 (!%p2857_p10), 1, %s2230_s19   ;;  %p2858_p12 = scmp.ne.s32.totalorder (!%p2857_p10), %s2852_s8, 0 }
  0x58   : > { %302 = sbr.rel (%p2857_p10) target bundleno = 1119 (0x45f), region = 40  ;;  %s1532_s14 = sshll.u32 (!%p2857_p10), %s304_s13, 3 }
  0x59   : > { %s305_s30 = scalar_lea.sflag (!%p2857_p10), [#allocation4], %s304_s13  ;;  %s2449_s15 = scalar_lea.vmem (!%p2857_p10), [#allocation3], %s1532_s14 }
  0x5d   : > { %2209 = dma.done.wait (%p2858_p12), %s305_s30, 128  }
  0x5e   : > { %2211 = vsyncadd (%p2858_p12), %s305_s30, 4294967168  ;;  %s2859_s4 = sadd.s32 4294967295, %s2254_s25   ;;  %s1533_s29 = sshll.u32 %s304_s13, 10 }
  0x5f   : > { %s313_s6 = sand.u32 1, %s2859_s4   ;;  %s2457_s11 = scalar_lea.vmem [#allocation5], %s1533_s29 }
  0x60   : > { %s314_s10 = scalar_lea.sflag [#allocation6], %s313_s6 }
  0x61   : > { %2213 = dma.done.wait (%p2858_p12), %s314_s10, 16384  }
  0x62   : > { %2215 = vsyncadd (%p2858_p12), %s314_s10, 4294950912  ;;  %p2860_p5 = scmp.ne.s32.totalorder %s2850_s7, 0 }
  0x64   : > { %2217 = dma.done.wait (%p2860_p5), [#allocation6], 128  }
  0x65   : > { %2219 = vsyncadd (%p2860_p5), [#allocation6], 4294967168 }
  0x66   : > { %2221 = dma.done.wait (%p2860_p5), [#allocation9], 16  }
  0x67   : > { %2223 = vsyncadd (%p2860_p5), [#allocation9], 4294967280  ;;  %p362_p1 = scmp.lt.s32.totalorder %s2242_s22, 1  ;;  %p1538_p2 = scmp.ne.s32.totalorder %s2238_s21, 0 }
  0x69   : > { %s2877_s22 = smov (!%p362_p1, %s2242_s22), 1  ;;  %373 = sbr.rel (%p1538_p2) target bundleno = 115 (0x73), region = 60 }
  0x6a   : > { %s1536_s16 = sshll.u32 %s2877_s22, 3 }
  0x6b   : > { %s2476_s18 = scalar_lea.vmem %s2835_s2, %s1536_s16  ;;  %s2481_s27 = scalar_lea.vmem %s2838_s5, %s1536_s16 }
  0x6e   : > { %v2265_v0 = vmov 0.0  }
  0x6f   : > { %374 = vst [vmem:[#allocation2] sm:$0x1] %v2265_v0  ;;  %375 = vst [vmem:[#allocation2 + $0x1] sm:$0x1] %v2265_v0 }
  0x70   : > { %376 = vst [vmem:[#allocation2 + $0x2] sm:$0x1] %v2265_v0  ;;  %377 = vst [vmem:[#allocation2 + $0x3] sm:$0x1] %v2265_v0 }
  0x71   : > { %378 = vst [vmem:[#allocation2 + $0x4] sm:$0x1] %v2265_v0  ;;  %379 = vst [vmem:[#allocation2 + $0x5] sm:$0x1] %v2265_v0 }
  0x72   : > { %380 = vst [vmem:[#allocation2 + $0x6] sm:$0x1] %v2265_v0  ;;  %381 = vst [vmem:[#allocation2 + $0x7] sm:$0x1] %v2265_v0 }
  0x73 PF: > { %v467_v1 = vld [vmem:[%s2457_s11 + $0x78] sm:$0xff]  ;;  %v2266_v3 = vmov 0.0   ;;  %v466_v4 = vld [vmem:[%s2457_s11 + $0x70] sm:$0xff]  ;;  %v465_v6 = vld [vmem:[%s2457_s11 + $0x68] sm:$0xff]  ;;  %v2267_v10 = vmov 1966171168   ;;  %v391_v12 = vlaneseq }
  0x74   : > { %v483_v2 = vld [vmem:[%s2457_s11 + $0xf8] sm:$0xff]  ;;  %1683 = vmatprep.subr.mxu0 %v2266_v3  ;;  %1718 = vmatprep.subr.mxu1 %v2266_v3  ;;  %v482_v5 = vld [vmem:[%s2457_s11 + $0xf0] sm:$0xff]  ;;  %v481_v7 = vld [vmem:[%s2457_s11 + $0xe8] sm:$0xff]  ;;  %v389_v11 = vunpack.c.l.s4 %v2267_v10  ;;  %vm2268_vm1 = vmmov 0   ;;  %p1540_p4 = scmp.ne.s32.totalorder %s2238_s21, 1 }
  0x75   : > { %1684 = vmatpush3.msra.mxu0 %v467_v1  ;;  %1719 = vmatpush3.msra.mxu1 %v483_v2  ;;  %v464_v8 = vld [vmem:[%s2457_s11 + $0x60] sm:$0xff]  ;;  %v463_v13 = vld [vmem:[%s2457_s11 + $0x58] sm:$0xff]  ;;  %v462_v15 = vld [vmem:[%s2457_s11 + $0x50] sm:$0xff]  ;;  %v2506_v18 = vshrl.u32 %v391_v12, 7 }
  0x76   : > { %1685 = vmatprep.subr.mxu0 %v2266_v3  ;;  %1720 = vmatprep.subr.mxu1 %v2266_v3  ;;  %v480_v9 = vld [vmem:[%s2457_s11 + $0xe0] sm:$0xff]  ;;  %v479_v14 = vld [vmem:[%s2457_s11 + $0xd8] sm:$0xff]  ;;  %v478_v16 = vld [vmem:[%s2457_s11 + $0xd0] sm:$0xff]  ;;  %v390_v17 = vunpack.c.0.s8 %v389_v11 }
  0x77   : > { %1686 = vmatpush3.msra.mxu0 %v466_v4  ;;  %1721 = vmatpush3.msra.mxu1 %v482_v5  ;;  %v382_v19 = vld [vmem:[%s2449_s15] sm:$0xff]  ;;  %v461_v20 = vld [vmem:[%s2457_s11 + $0x48] sm:$0xff]  ;;  %v460_v23 = vld [vmem:[%s2457_s11 + $0x40] sm:$0xff] }
  0x78   : > { %1687 = vmatprep.subr.mxu0 %v2266_v3  ;;  %1722 = vmatprep.subr.mxu1 %v2266_v3  ;;  %v477_v21 = vld [vmem:[%s2457_s11 + $0xc8] sm:$0xff]  ;;  %vm383_vm0 = vcmp.ne.s32.totalorder %v382_v19, 0  ;;  %v476_v24 = vld [vmem:[%s2457_s11 + $0xc0] sm:$0xff]  ;;  %v2519_v26 = vsub.s32 %v390_v17, %v2506_v18  ;;  %v459_v27 = vld [vmem:[%s2457_s11 + $0x38] sm:$0xff] }
  0x79   : > { %1688 = vmatpush3.msra.mxu0 %v465_v6  ;;  %1723 = vmatpush3.msra.mxu1 %v481_v7  ;;  %v1539_v22 = vsel %vm383_vm0, 1.0, %v2266_v3  ;;  %v475_v28 = vld [vmem:[%s2457_s11 + $0xb8] sm:$0xff]  ;;  %v458_v30 = vld [vmem:[%s2457_s11 + $0x30] sm:$0xff]  ;;  %v457_v34 = vld [vmem:[%s2457_s11 + $0x28] sm:$0xff] }
  0x7a   : > { %1689 = vmatprep.subr.mxu0 %v2266_v3  ;;  %1724 = vmatprep.subr.mxu1 %v2266_v3  ;;  %v387_v25 = vcombine.high %v1539_v22, %v1539_v22  ;;  %v474_v31 = vld [vmem:[%s2457_s11 + $0xb0] sm:$0xff]  ;;  %v473_v35 = vld [vmem:[%s2457_s11 + $0xa8] sm:$0xff]  ;;  %v456_v37 = vld [vmem:[%s2457_s11 + $0x20] sm:$0xff]  ;;  %v394_v39 = vrot.slane %v1539_v22, %v2519_v26 }
  0x7b   : > { %1690 = vmatpush3.msra.mxu0 %v464_v8  ;;  %1725 = vmatpush3.msra.mxu1 %v480_v9  ;;  %v472_v38 = vld [vmem:[%s2457_s11 + $0xa0] sm:$0xff]  ;;  %v455_v40 = vld [vmem:[%s2457_s11 + $0x18] sm:$0xff]  ;;  %v454_v42 = vld [vmem:[%s2457_s11 + $0x10] sm:$0xff] }
  0x7c   : > { %1691 = vmatprep.subr.mxu0 %v2266_v3  ;;  %1726 = vmatprep.subr.mxu1 %v2266_v3  ;;  %v401_v29 = vrot.slane %v387_v25, %v2519_v26  ;;  %v471_v41 = vld [vmem:[%s2457_s11 + $0x98] sm:$0xff]  ;;  %v470_v43 = vld [vmem:[%s2457_s11 + $0x90] sm:$0xff]  ;;  %v402_v44 = vcombine.high %v394_v39, %v394_v39  ;;  %v453_v45 = vld [vmem:[%s2457_s11 + $0x8] sm:$0xff]  ;;  %v2562_v49 = vrot.slane %v394_v39, %v2519_v26 }
  0x7d   : > { %1692 = vmatpush3.msra.mxu0 %v463_v13  ;;  %1727 = vmatpush3.msra.mxu1 %v479_v14  ;;  %v469_v46 = vld [vmem:[%s2457_s11 + $0x88] sm:$0xff]  ;;  %v452_v47 = vld [vmem:[%s2457_s11] sm:$0xff]  ;;  %v499_v51 = vld [vmem:[%s2457_s11 + $0x178] sm:$0xff] }
  0x7e   : > { %1693 = vmatprep.subr.mxu0 %v2266_v3  ;;  %1728 = vmatprep.subr.mxu1 %v2266_v3  ;;  %v2531_v32 = vrot.slane %v401_v29, %v2519_v26  ;;  %v403_v33 = vcombine.high %v401_v29, %v401_v29  ;;  %v468_v48 = vld [vmem:[%s2457_s11 + $0x80] sm:$0xff]  ;;  %v2565_v50 = vrot.slane %v402_v44, %v2519_v26  ;;  %v515_v52 = vld [vmem:[%s2457_s11 + $0x1f8] sm:$0xff]  ;;  %v498_v53 = vld [vmem:[%s2457_s11 + $0x170] sm:$0xff] }
  0x7f   : > { %1694 = vmatpush3.msra.mxu0 %v462_v15  ;;  %1729 = vmatpush3.msra.mxu1 %v478_v16  ;;  %v514_v54 = vld [vmem:[%s2457_s11 + $0x1f0] sm:$0xff]  ;;  %v497_v55 = vld [vmem:[%s2457_s11 + $0x168] sm:$0xff]  ;;  %v496_v57 = vld [vmem:[%s2457_s11 + $0x160] sm:$0xff] }
  0x80   : > { %1695 = vmatprep.subr.mxu0 %v2266_v3  ;;  %1730 = vmatprep.subr.mxu1 %v2266_v3  ;;  %v2538_v36 = vrot.slane %v403_v33, %v2519_v26  ;;  %v513_v56 = vld [vmem:[%s2457_s11 + $0x1e8] sm:$0xff]  ;;  %v512_v58 = vld [vmem:[%s2457_s11 + $0x1e0] sm:$0xff]  ;;  %v495_v59 = vld [vmem:[%s2457_s11 + $0x158] sm:$0xff] }
  0x81   : > { %1696 = vmatpush3.msra.mxu0 %v461_v20  ;;  %1731 = vmatpush3.msra.mxu1 %v477_v21  ;;  %v511_v60 = vld [vmem:[%s2457_s11 + $0x1d8] sm:$0xff]  ;;  %v494_v61 = vld [vmem:[%s2457_s11 + $0x150] sm:$0xff]  ;;  %v493_v63 = vld [vmem:[%s2457_s11 + $0x148] sm:$0xff]  ;;  %v432_v20 = vcombine.high %v2562_v49, %v2562_v49  ;;  %v434_v21 = vcombine.high %v2565_v50, %v2565_v50 }
  0x82   : > { %1697 = vmatprep.subr.mxu0 %v2266_v3  ;;  %1732 = vmatprep.subr.mxu1 %v2266_v3  ;;  %v510_v62 = vld [vmem:[%s2457_s11 + $0x1d0] sm:$0xff]  ;;  %v509_v0 = vld [vmem:[%s2457_s11 + $0x1c8] sm:$0xff]  ;;  %v492_v1 = vld [vmem:[%s2457_s11 + $0x140] sm:$0xff] }
  0x83   : > { %1698 = vmatpush3.msra.mxu0 %v460_v23  ;;  %1733 = vmatpush3.msra.mxu1 %v476_v24  ;;  %v508_v2 = vld [vmem:[%s2457_s11 + $0x1c0] sm:$0xff]  ;;  %v491_v4 = vld [vmem:[%s2457_s11 + $0x138] sm:$0xff]  ;;  %v490_v6 = vld [vmem:[%s2457_s11 + $0x130] sm:$0xff] }
  0x84   : > { %1699 = vmatprep.subr.mxu0 %v2266_v3  ;;  %1734 = vmatprep.subr.mxu1 %v2266_v3  ;;  %v507_v5 = vld [vmem:[%s2457_s11 + $0x1b8] sm:$0xff]  ;;  %v506_v7 = vld [vmem:[%s2457_s11 + $0x1b0] sm:$0xff]  ;;  %v489_v8 = vld [vmem:[%s2457_s11 + $0x128] sm:$0xff] }
  0x85   : > { %1700 = vmatpush3.msra.mxu0 %v459_v27  ;;  %1735 = vmatpush3.msra.mxu1 %v475_v28  ;;  %v505_v9 = vld [vmem:[%s2457_s11 + $0x1a8] sm:$0xff]  ;;  %v488_v10 = vld [vmem:[%s2457_s11 + $0x120] sm:$0xff]  ;;  %v487_v12 = vld [vmem:[%s2457_s11 + $0x118] sm:$0xff] }
  0x86   : > { %1701 = vmatprep.subr.mxu0 %v2266_v3  ;;  %1736 = vmatprep.subr.mxu1 %v2266_v3  ;;  %v504_v11 = vld [vmem:[%s2457_s11 + $0x1a0] sm:$0xff]  ;;  %v503_v13 = vld [vmem:[%s2457_s11 + $0x198] sm:$0xff]  ;;  %v486_v14 = vld [vmem:[%s2457_s11 + $0x110] sm:$0xff] }
  0x87   : > { %1702 = vmatpush3.msra.mxu0 %v458_v30  ;;  %1737 = vmatpush3.msra.mxu1 %v474_v31  ;;  %v502_v15 = vld [vmem:[%s2457_s11 + $0x190] sm:$0xff]  ;;  %v485_v16 = vld [vmem:[%s2457_s11 + $0x108] sm:$0xff]  ;;  %v484_v19 = vld [vmem:[%s2457_s11 + $0x100] sm:$0xff] }
  0x88   : > { %1703 = vmatprep.subr.mxu0 %v2266_v3  ;;  %1738 = vmatprep.subr.mxu1 %v2266_v3  ;;  %v501_v17 = vld [vmem:[%s2457_s11 + $0x188] sm:$0xff]  ;;  %v500_v22 = vld [vmem:[%s2457_s11 + $0x180] sm:$0xff]  ;;  %v531_v23 = vld [vmem:[%s2457_s11 + $0x278] sm:$0xff] }
  0x89   : > { %1704 = vmatpush3.msra.mxu0 %v457_v34  ;;  %1739 = vmatpush3.msra.mxu1 %v473_v35  ;;  %v547_v24 = vld [vmem:[%s2457_s11 + $0x2f8] sm:$0xff]  ;;  %v530_v25 = vld [vmem:[%s2457_s11 + $0x270] sm:$0xff]  ;;  %v529_v28 = vld [vmem:[%s2457_s11 + $0x268] sm:$0xff] }
  0x8a   : > { %1705 = vmatprep.subr.mxu0 %v2266_v3  ;;  %1740 = vmatprep.subr.mxu1 %v2266_v3  ;;  %v546_v27 = vld [vmem:[%s2457_s11 + $0x2f0] sm:$0xff]  ;;  %v545_v29 = vld [vmem:[%s2457_s11 + $0x2e8] sm:$0xff]  ;;  %v528_v30 = vld [vmem:[%s2457_s11 + $0x260] sm:$0xff] }
  0x8b   : > { %1706 = vmatpush3.msra.mxu0 %v456_v37  ;;  %1741 = vmatpush3.msra.mxu1 %v472_v38  ;;  %v544_v31 = vld [vmem:[%s2457_s11 + $0x2e0] sm:$0xff]  ;;  %v527_v33 = vld [vmem:[%s2457_s11 + $0x258] sm:$0xff]  ;;  %v526_v35 = vld [vmem:[%s2457_s11 + $0x250] sm:$0xff] }
  0x8c   : > { %1707 = vmatprep.subr.mxu0 %v2266_v3  ;;  %1742 = vmatprep.subr.mxu1 %v2266_v3  ;;  %v543_v34 = vld [vmem:[%s2457_s11 + $0x2d8] sm:$0xff]  ;;  %v542_v37 = vld [vmem:[%s2457_s11 + $0x2d0] sm:$0xff]  ;;  %v525_v38 = vld [vmem:[%s2457_s11 + $0x248] sm:$0xff] }
  0x8d   : > { %1708 = vmatpush3.msra.mxu0 %v455_v40  ;;  %1743 = vmatpush3.msra.mxu1 %v471_v41  ;;  %v541_v39 = vld [vmem:[%s2457_s11 + $0x2c8] sm:$0xff]  ;;  %v524_v40 = vld [vmem:[%s2457_s11 + $0x240] sm:$0xff]  ;;  %v522_v44 = vld [vmem:[%s2457_s11 + $0x230] sm:$0xff] }
  0x8e   : > { %1709 = vmatprep.subr.mxu0 %v2266_v3  ;;  %1744 = vmatprep.subr.mxu1 %v2266_v3  ;;  %v540_v41 = vld [vmem:[%s2457_s11 + $0x2c0] sm:$0xff] }
  0x8f   : > { %1710 = vmatpush3.msra.mxu0 %v454_v42  ;;  %1745 = vmatpush3.msra.mxu1 %v470_v43  ;;  %v523_v42 = vld [vmem:[%s2457_s11 + $0x238] sm:$0xff] }
  0x90   : > { %1711 = vmatprep.subr.mxu0 %v2266_v3  ;;  %1746 = vmatprep.subr.mxu1 %v2266_v3  ;;  %v539_v43 = vld [vmem:[%s2457_s11 + $0x2b8] sm:$0xff] }
  0x91   : > { %1712 = vmatpush3.msra.mxu0 %v453_v45  ;;  %1747 = vmatpush3.msra.mxu1 %v469_v46  ;;  %v538_v45 = vld [vmem:[%s2457_s11 + $0x2b0] sm:$0xff]  ;;  %v521_v46 = vld [vmem:[%s2457_s11 + $0x228] sm:$0xff] }
  0x92   : > { %1713 = vmatprep.subr.mxu0 %v2266_v3  ;;  %1748 = vmatprep.subr.mxu1 %v2266_v3 }
  0x93   : > { %1714 = vmatpush3.msra.mxu0 %v452_v47  ;;  %1715 = vmatprep.mubr.msk.f32.mxu0 %vm2268_vm1, %v2266_v3  ;;  %v537_v47 = vld [vmem:[%s2457_s11 + $0x2a8] sm:$0xff] }
  0x94   : > { %1749 = vmatpush3.msra.mxu1 %v468_v48  ;;  %1750 = vmatprep.mubr.msk.f32.mxu1 %vm2268_vm1, %v2266_v3  ;;  %v520_v48 = vld [vmem:[%s2457_s11 + $0x220] sm:$0xff] }
  0x95   : > { %1716 = vmatmul.mubr.f32.vlgmr.msra.gmra.mxu0 %v2562_v49  ;;  %1751 = vmatmul.mubr.f32.vlgmr.msra.gmra.mxu1 %v2565_v50  ;;  %v536_v49 = vld [vmem:[%s2457_s11 + $0x2a0] sm:$0xff]  ;;  %v519_v50 = vld [vmem:[%s2457_s11 + $0x218] sm:$0xff] }
  0x96   : > { %1753 = vmatprep.subr.mxu0 %v2266_v3  ;;  %1788 = vmatprep.subr.mxu1 %v2266_v3 }
  0x97   : > { %1754 = vmatpush3.msra.mxu0 %v499_v51  ;;  %1789 = vmatpush3.msra.mxu1 %v515_v52  ;;  %v535_v51 = vld [vmem:[%s2457_s11 + $0x298] sm:$0xff]  ;;  %v518_v52 = vld [vmem:[%s2457_s11 + $0x210] sm:$0xff] }
  0x98   : > { %1755 = vmatprep.subr.mxu0 %v2266_v3  ;;  %1790 = vmatprep.subr.mxu1 %v2266_v3 }
  0x99   : > { %1756 = vmatpush3.msra.mxu0 %v498_v53  ;;  %1791 = vmatpush3.msra.mxu1 %v514_v54  ;;  %v534_v53 = vld [vmem:[%s2457_s11 + $0x290] sm:$0xff]  ;;  %v517_v54 = vld [vmem:[%s2457_s11 + $0x208] sm:$0xff] }
  0x9a   : > { %1757 = vmatprep.subr.mxu0 %v2266_v3  ;;  %1792 = vmatprep.subr.mxu1 %v2266_v3 }
  0x9b   : > { %1758 = vmatpush3.msra.mxu0 %v497_v55  ;;  %1793 = vmatpush3.msra.mxu1 %v513_v56  ;;  %v533_v55 = vld [vmem:[%s2457_s11 + $0x288] sm:$0xff]  ;;  %v516_v56 = vld [vmem:[%s2457_s11 + $0x200] sm:$0xff] }
  0x9c   : > { %1759 = vmatprep.subr.mxu0 %v2266_v3  ;;  %1794 = vmatprep.subr.mxu1 %v2266_v3 }
  0x9d   : > { %1760 = vmatpush3.msra.mxu0 %v496_v57  ;;  %1795 = vmatpush3.msra.mxu1 %v512_v58  ;;  %v532_v57 = vld [vmem:[%s2457_s11 + $0x280] sm:$0xff]  ;;  %v563_v58 = vld [vmem:[%s2457_s11 + $0x378] sm:$0xff] }
  0x9e   : > { %1761 = vmatprep.subr.mxu0 %v2266_v3  ;;  %1796 = vmatprep.subr.mxu1 %v2266_v3 }
  0x9f   : > { %1762 = vmatpush3.msra.mxu0 %v495_v59  ;;  %1797 = vmatpush3.msra.mxu1 %v511_v60  ;;  %v579_v59 = vld [vmem:[%s2457_s11 + $0x3f8] sm:$0xff]  ;;  %v562_v60 = vld [vmem:[%s2457_s11 + $0x370] sm:$0xff] }
  0xa0   : > { %1763 = vmatprep.subr.mxu0 %v2266_v3  ;;  %1798 = vmatprep.subr.mxu1 %v2266_v3 }
  0xa1   : > { %1764 = vmatpush3.msra.mxu0 %v494_v61  ;;  %1799 = vmatpush3.msra.mxu1 %v510_v62  ;;  %v578_v61 = vld [vmem:[%s2457_s11 + $0x3f0] sm:$0xff]  ;;  %v561_v62 = vld [vmem:[%s2457_s11 + $0x368] sm:$0xff] }
  0xa2   : > { %1765 = vmatprep.subr.mxu0 %v2266_v3  ;;  %1800 = vmatprep.subr.mxu1 %v2266_v3 }
  0xa3   : > { %1766 = vmatpush3.msra.mxu0 %v493_v63  ;;  %1801 = vmatpush3.msra.mxu1 %v509_v0  ;;  %v577_v63 = vld [vmem:[%s2457_s11 + $0x3e8] sm:$0xff]  ;;  %v560_v0 = vld [vmem:[%s2457_s11 + $0x360] sm:$0xff] }
  0xa4   : > { %1767 = vmatprep.subr.mxu0 %v2266_v3  ;;  %1802 = vmatprep.subr.mxu1 %v2266_v3 }
  0xa5   : > { %1768 = vmatpush3.msra.mxu0 %v492_v1  ;;  %1803 = vmatpush3.msra.mxu1 %v508_v2  ;;  %v576_v1 = vld [vmem:[%s2457_s11 + $0x3e0] sm:$0xff]  ;;  %v559_v2 = vld [vmem:[%s2457_s11 + $0x358] sm:$0xff] }
  0xa6   : > { %1769 = vmatprep.subr.mxu0 %v2266_v3  ;;  %1804 = vmatprep.subr.mxu1 %v2266_v3 }
  0xa7   : > { %1770 = vmatpush3.msra.mxu0 %v491_v4  ;;  %1805 = vmatpush3.msra.mxu1 %v507_v5  ;;  %v575_v4 = vld [vmem:[%s2457_s11 + $0x3d8] sm:$0xff]  ;;  %v558_v5 = vld [vmem:[%s2457_s11 + $0x350] sm:$0xff] }
  0xa8   : > { %1771 = vmatprep.subr.mxu0 %v2266_v3  ;;  %1806 = vmatprep.subr.mxu1 %v2266_v3 }
  0xa9   : > { %1772 = vmatpush3.msra.mxu0 %v490_v6  ;;  %1807 = vmatpush3.msra.mxu1 %v506_v7  ;;  %v574_v6 = vld [vmem:[%s2457_s11 + $0x3d0] sm:$0xff]  ;;  %v557_v7 = vld [vmem:[%s2457_s11 + $0x348] sm:$0xff] }
  0xaa   : > { %1773 = vmatprep.subr.mxu0 %v2266_v3  ;;  %1808 = vmatprep.subr.mxu1 %v2266_v3 }
  0xab   : > { %1774 = vmatpush3.msra.mxu0 %v489_v8  ;;  %1809 = vmatpush3.msra.mxu1 %v505_v9  ;;  %v573_v8 = vld [vmem:[%s2457_s11 + $0x3c8] sm:$0xff]  ;;  %v556_v9 = vld [vmem:[%s2457_s11 + $0x340] sm:$0xff] }
  0xac   : > { %1775 = vmatprep.subr.mxu0 %v2266_v3  ;;  %1810 = vmatprep.subr.mxu1 %v2266_v3 }
  0xad   : > { %1776 = vmatpush3.msra.mxu0 %v488_v10  ;;  %1811 = vmatpush3.msra.mxu1 %v504_v11  ;;  %v572_v10 = vld [vmem:[%s2457_s11 + $0x3c0] sm:$0xff]  ;;  %v555_v11 = vld [vmem:[%s2457_s11 + $0x338] sm:$0xff] }
  0xae   : > { %1777 = vmatprep.subr.mxu0 %v2266_v3  ;;  %1812 = vmatprep.subr.mxu1 %v2266_v3 }
  0xaf   : > { %1778 = vmatpush3.msra.mxu0 %v487_v12  ;;  %1813 = vmatpush3.msra.mxu1 %v503_v13  ;;  %v571_v12 = vld [vmem:[%s2457_s11 + $0x3b8] sm:$0xff]  ;;  %v554_v13 = vld [vmem:[%s2457_s11 + $0x330] sm:$0xff] }
  0xb0   : > { %1779 = vmatprep.subr.mxu0 %v2266_v3  ;;  %1814 = vmatprep.subr.mxu1 %v2266_v3 }
  0xb1   : > { %1780 = vmatpush3.msra.mxu0 %v486_v14  ;;  %1815 = vmatpush3.msra.mxu1 %v502_v15  ;;  %v570_v14 = vld [vmem:[%s2457_s11 + $0x3b0] sm:$0xff]  ;;  %v553_v15 = vld [vmem:[%s2457_s11 + $0x328] sm:$0xff] }
  0xb2   : > { %1781 = vmatprep.subr.mxu0 %v2266_v3  ;;  %1816 = vmatprep.subr.mxu1 %v2266_v3 }
  0xb3   : > { %1782 = vmatpush3.msra.mxu0 %v485_v16  ;;  %1817 = vmatpush3.msra.mxu1 %v501_v17  ;;  %v569_v16 = vld [vmem:[%s2457_s11 + $0x3a8] sm:$0xff]  ;;  %v552_v17 = vld [vmem:[%s2457_s11 + $0x320] sm:$0xff] }
  0xb4   : > { %1783 = vmatprep.subr.mxu0 %v2266_v3  ;;  %1818 = vmatprep.subr.mxu1 %v2266_v3 }
  0xb5   : > { %1784 = vmatpush3.msra.mxu0 %v484_v19  ;;  %1785 = vmatprep.mubr.msk.f32.mxu0 %vm2268_vm1, %v2266_v3  ;;  %v568_v19 = vld [vmem:[%s2457_s11 + $0x3a0] sm:$0xff] }
  0xb6   : > { %1819 = vmatpush3.msra.mxu1 %v500_v22  ;;  %1820 = vmatprep.mubr.msk.f32.mxu1 %vm2268_vm1, %v2266_v3  ;;  %v550_v22 = vld [vmem:[%s2457_s11 + $0x310] sm:$0xff] }
  0xb7   : > { %1786 = vmatmul.mubr.f32.vlgmr.msra.gmra.mxu0 %v432_v20  ;;  %1821 = vmatmul.mubr.f32.vlgmr.msra.gmra.mxu1 %v434_v21  ;;  %v551_v20 = vld [vmem:[%s2457_s11 + $0x318] sm:$0xff] }
  0xb8   : > { %1823 = vmatprep.subr.mxu0 %v2266_v3  ;;  %1858 = vmatprep.subr.mxu1 %v2266_v3  ;;  %v567_v21 = vld [vmem:[%s2457_s11 + $0x398] sm:$0xff] }
  0xb9   : > { %1824 = vmatpush3.msra.mxu0 %v531_v23  ;;  %1859 = vmatpush3.msra.mxu1 %v547_v24  ;;  %v566_v23 = vld [vmem:[%s2457_s11 + $0x390] sm:$0xff]  ;;  %v549_v24 = vld [vmem:[%s2457_s11 + $0x308] sm:$0xff] }
  0xba   : > { %1825 = vmatprep.subr.mxu0 %v2266_v3  ;;  %1860 = vmatprep.subr.mxu1 %v2266_v3 }
  0xbb   : > { %1826 = vmatpush3.msra.mxu0 %v530_v25  ;;  %1861 = vmatpush3.msra.mxu1 %v546_v27  ;;  %v565_v25 = vld [vmem:[%s2457_s11 + $0x388] sm:$0xff]  ;;  %v548_v27 = vld [vmem:[%s2457_s11 + $0x300] sm:$0xff] }
  0xbc   : > { %1827 = vmatprep.subr.mxu0 %v2266_v3  ;;  %1862 = vmatprep.subr.mxu1 %v2266_v3 }
  0xbd   : > { %1828 = vmatpush3.msra.mxu0 %v529_v28  ;;  %1863 = vmatpush3.msra.mxu1 %v545_v29  ;;  %v564_v28 = vld [vmem:[%s2457_s11 + $0x380] sm:$0xff]  ;;  %v433_v29 = vcombine.high %v2531_v32, %v2531_v32 }
  0xbe   : > { %1829 = vmatprep.subr.mxu0 %v2266_v3  ;;  %1864 = vmatprep.subr.mxu1 %v2266_v3 }
  0xbf   : > { %1830 = vmatpush3.msra.mxu0 %v528_v30  ;;  %1865 = vmatpush3.msra.mxu1 %v544_v31  ;;  %v435_v30 = vcombine.high %v2538_v36, %v2538_v36  ;;  %v444_v31 = vld [vmem:[#allocation2] sm:$0x1] }
  0xc0   : > { %1831 = vmatprep.subr.mxu0 %v2266_v3  ;;  %1866 = vmatprep.subr.mxu1 %v2266_v3 }
  0xc1   : > { %1832 = vmatpush3.msra.mxu0 %v527_v33  ;;  %1867 = vmatpush3.msra.mxu1 %v543_v34  ;;  %v445_v33 = vld [vmem:[#allocation2 + $0x1] sm:$0x1] }
  0xc2   : > { %1833 = vmatprep.subr.mxu0 %v2266_v3  ;;  %1868 = vmatprep.subr.mxu1 %v2266_v3 }
  0xc3   : > { %1834 = vmatpush3.msra.mxu0 %v526_v35  ;;  %1869 = vmatpush3.msra.mxu1 %v542_v37 }
  0xc4   : > { %1835 = vmatprep.subr.mxu0 %v2266_v3  ;;  %1870 = vmatprep.subr.mxu1 %v2266_v3 }
  0xc5   : > { %1836 = vmatpush3.msra.mxu0 %v525_v38  ;;  %1871 = vmatpush3.msra.mxu1 %v541_v39  ;;  %v446_v39 = vld [vmem:[#allocation2 + $0x2] sm:$0x1] }
  0xc6   : > { %1837 = vmatprep.subr.mxu0 %v2266_v3  ;;  %1872 = vmatprep.subr.mxu1 %v2266_v3 }
  0xc7   : > { %1838 = vmatpush3.msra.mxu0 %v524_v40  ;;  %1873 = vmatpush3.msra.mxu1 %v540_v41  ;;  %v447_v40 = vld [vmem:[#allocation2 + $0x3] sm:$0x1] }
  0xc8   : > { %1839 = vmatprep.subr.mxu0 %v2266_v3  ;;  %1874 = vmatprep.subr.mxu1 %v2266_v3 }
  0xc9   : > { %1840 = vmatpush3.msra.mxu0 %v523_v42  ;;  %1875 = vmatpush3.msra.mxu1 %v539_v43 }
  0xca   : > { %1841 = vmatprep.subr.mxu0 %v2266_v3  ;;  %1876 = vmatprep.subr.mxu1 %v2266_v3 }
  0xcb   : > { %1842 = vmatpush3.msra.mxu0 %v522_v44  ;;  %1877 = vmatpush3.msra.mxu1 %v538_v45 }
  0xcc   : > { %1843 = vmatprep.subr.mxu0 %v2266_v3  ;;  %1878 = vmatprep.subr.mxu1 %v2266_v3 }
  0xcd   : > { %1844 = vmatpush3.msra.mxu0 %v521_v46  ;;  %1879 = vmatpush3.msra.mxu1 %v537_v47  ;;  %v448_v46 = vld [vmem:[#allocation2 + $0x4] sm:$0x1]  ;;  %v449_v47 = vld [vmem:[#allocation2 + $0x5] sm:$0x1] }
  0xce   : > { %1845 = vmatprep.subr.mxu0 %v2266_v3  ;;  %1880 = vmatprep.subr.mxu1 %v2266_v3 }
  0xcf   : > { %1846 = vmatpush3.msra.mxu0 %v520_v48  ;;  %1881 = vmatpush3.msra.mxu1 %v536_v49 }
  0xd0   : > { %1847 = vmatprep.subr.mxu0 %v2266_v3  ;;  %1882 = vmatprep.subr.mxu1 %v2266_v3 }
  0xd1   : > { %1848 = vmatpush3.msra.mxu0 %v519_v50  ;;  %1883 = vmatpush3.msra.mxu1 %v535_v51 }
  0xd2   : > { %1849 = vmatprep.subr.mxu0 %v2266_v3  ;;  %1884 = vmatprep.subr.mxu1 %v2266_v3 }
  0xd3   : > { %1850 = vmatpush3.msra.mxu0 %v518_v52  ;;  %1885 = vmatpush3.msra.mxu1 %v534_v53 }
  0xd4   : > { %1851 = vmatprep.subr.mxu0 %v2266_v3  ;;  %1886 = vmatprep.subr.mxu1 %v2266_v3 }
  0xd5   : > { %1852 = vmatpush3.msra.mxu0 %v517_v54  ;;  %1887 = vmatpush3.msra.mxu1 %v533_v55  ;;  %v450_v54 = vld [vmem:[#allocation2 + $0x6] sm:$0x1]  ;;  %v451_v55 = vld [vmem:[#allocation2 + $0x7] sm:$0x1] }
  0xd6   : > { %1853 = vmatprep.subr.mxu0 %v2266_v3  ;;  %1888 = vmatprep.subr.mxu1 %v2266_v3 }
  0xd7   : > { %1854 = vmatpush3.msra.mxu0 %v516_v56  ;;  %1855 = vmatprep.mubr.msk.f32.mxu0 %vm2268_vm1, %v2266_v3 }
  0xd8   : > { %1889 = vmatpush3.msra.mxu1 %v532_v57  ;;  %1890 = vmatprep.mubr.msk.f32.mxu1 %vm2268_vm1, %v2266_v3 }
  0xd9   : > { %1856 = vmatmul.mubr.f32.vlgmr.msra.gmra.mxu0 %v2531_v32  ;;  %1891 = vmatmul.mubr.f32.vlgmr.msra.gmra.mxu1 %v2538_v36 }
  0xda   : > { %1893 = vmatprep.subr.mxu0 %v2266_v3  ;;  %1928 = vmatprep.subr.mxu1 %v2266_v3 }
  0xdb   : > { %1894 = vmatpush3.msra.mxu0 %v563_v58  ;;  %1929 = vmatpush3.msra.mxu1 %v579_v59 }
  0xdc   : > { %1895 = vmatprep.subr.mxu0 %v2266_v3  ;;  %1930 = vmatprep.subr.mxu1 %v2266_v3 }
  0xdd   : > { %1896 = vmatpush3.msra.mxu0 %v562_v60  ;;  %1931 = vmatpush3.msra.mxu1 %v578_v61 }
  0xde   : > { %1897 = vmatprep.subr.mxu0 %v2266_v3  ;;  %1932 = vmatprep.subr.mxu1 %v2266_v3 }
  0xdf   : > { %1898 = vmatpush3.msra.mxu0 %v561_v62  ;;  %1933 = vmatpush3.msra.mxu1 %v577_v63 }
  0xe0   : > { %1899 = vmatprep.subr.mxu0 %v2266_v3  ;;  %1934 = vmatprep.subr.mxu1 %v2266_v3 }
  0xe1   : > { %1900 = vmatpush3.msra.mxu0 %v560_v0  ;;  %1935 = vmatpush3.msra.mxu1 %v576_v1 }
  0xe2   : > { %1901 = vmatprep.subr.mxu0 %v2266_v3  ;;  %1936 = vmatprep.subr.mxu1 %v2266_v3 }
  0xe3   : > { %1902 = vmatpush3.msra.mxu0 %v559_v2  ;;  %1937 = vmatpush3.msra.mxu1 %v575_v4 }
  0xe4   : > { %1903 = vmatprep.subr.mxu0 %v2266_v3  ;;  %1938 = vmatprep.subr.mxu1 %v2266_v3 }
  0xe5   : > { %1904 = vmatpush3.msra.mxu0 %v558_v5  ;;  %1939 = vmatpush3.msra.mxu1 %v574_v6 }
  0xe6   : > { %1905 = vmatprep.subr.mxu0 %v2266_v3  ;;  %1940 = vmatprep.subr.mxu1 %v2266_v3 }
  0xe7   : > { %1906 = vmatpush3.msra.mxu0 %v557_v7  ;;  %1941 = vmatpush3.msra.mxu1 %v573_v8 }
  0xe8   : > { %1907 = vmatprep.subr.mxu0 %v2266_v3  ;;  %1942 = vmatprep.subr.mxu1 %v2266_v3 }
  0xe9   : > { %1908 = vmatpush3.msra.mxu0 %v556_v9  ;;  %1943 = vmatpush3.msra.mxu1 %v572_v10 }
  0xea   : > { %1909 = vmatprep.subr.mxu0 %v2266_v3  ;;  %1944 = vmatprep.subr.mxu1 %v2266_v3 }
  0xeb   : > { %1910 = vmatpush3.msra.mxu0 %v555_v11  ;;  %1945 = vmatpush3.msra.mxu1 %v571_v12 }
  0xec   : > { %1911 = vmatprep.subr.mxu0 %v2266_v3  ;;  %1946 = vmatprep.subr.mxu1 %v2266_v3 }
  0xed   : > { %1912 = vmatpush3.msra.mxu0 %v554_v13  ;;  %1947 = vmatpush3.msra.mxu1 %v570_v14 }
  0xee   : > { %1913 = vmatprep.subr.mxu0 %v2266_v3  ;;  %1948 = vmatprep.subr.mxu1 %v2266_v3 }
  0xef   : > { %1914 = vmatpush3.msra.mxu0 %v553_v15  ;;  %1949 = vmatpush3.msra.mxu1 %v569_v16 }
  0xf0   : > { %1915 = vmatprep.subr.mxu0 %v2266_v3  ;;  %1950 = vmatprep.subr.mxu1 %v2266_v3 }
  0xf1   : > { %1916 = vmatpush3.msra.mxu0 %v552_v17  ;;  %1951 = vmatpush3.msra.mxu1 %v568_v19 }
  0xf2   : > { %1917 = vmatprep.subr.mxu0 %v2266_v3  ;;  %1952 = vmatprep.subr.mxu1 %v2266_v3 }
  0xf3   : > { %1918 = vmatpush3.msra.mxu0 %v551_v20  ;;  %1953 = vmatpush3.msra.mxu1 %v567_v21 }
  0xf4   : > { %1919 = vmatprep.subr.mxu0 %v2266_v3  ;;  %1954 = vmatprep.subr.mxu1 %v2266_v3 }
  0xf5   : > { %1920 = vmatpush3.msra.mxu0 %v550_v22  ;;  %1955 = vmatpush3.msra.mxu1 %v566_v23 }
  0xf6   : > { %1921 = vmatprep.subr.mxu0 %v2266_v3  ;;  %1956 = vmatprep.subr.mxu1 %v2266_v3 }
  0xf7   : > { %1922 = vmatpush3.msra.mxu0 %v549_v24  ;;  %1957 = vmatpush3.msra.mxu1 %v565_v25 }
  0xf8   : > { %1923 = vmatprep.subr.mxu0 %v2266_v3  ;;  %1958 = vmatprep.subr.mxu1 %v2266_v3 }
  0xf9   : > { %1924 = vmatpush3.msra.mxu0 %v548_v27  ;;  %1925 = vmatprep.mubr.msk.f32.mxu0 %vm2268_vm1, %v2266_v3 }
  0xfa   : > { %1959 = vmatpush3.msra.mxu1 %v564_v28  ;;  %1960 = vmatprep.mubr.msk.f32.mxu1 %vm2268_vm1, %v2266_v3 }
  0xfb   : > { %1926 = vmatmul.mubr.f32.vlgmr.msra.gmra.mxu0 %v433_v29  ;;  %1961 = vmatmul.mubr.f32.vlgmr.msra.gmra.mxu1 %v435_v30 }
 0x155   : > { %v646_v32 = vpop.f32.mrf.mxu0  ;;  %v716_v34 = vpop.f32.mrf.mxu1 }
 0x156   : > { %v1140_v35 = vadd.f32 %v646_v32, %v444_v31  ;;  %v1141_v36 = vadd.f32 %v716_v34, %v445_v33 }
 0x157   : > { %v1717_v37 = vpop.f32.mrf.mxu0  ;;  %v1752_v38 = vpop.f32.mrf.mxu1 }
 0x158   : > { %1148 = vst [vmem:[#allocation2] sm:$0x1] %v1140_v35  ;;  %1149 = vst [vmem:[#allocation2 + $0x1] sm:$0x1] %v1141_v36 }
 0x177   : > { %v786_v41 = vpop.f32.mrf.mxu0  ;;  %v856_v42 = vpop.f32.mrf.mxu1 }
 0x178   : > { %v1142_v43 = vadd.f32 %v786_v41, %v446_v39  ;;  %v1143_v44 = vadd.f32 %v856_v42, %v447_v40 }
 0x179   : > { %v1787_v45 = vpop.f32.mrf.mxu0  ;;  %v1822_v3 = vpop.f32.mrf.mxu1 }
 0x17a   : > { %1150 = vst [vmem:[#allocation2 + $0x2] sm:$0x1] %v1142_v43  ;;  %1151 = vst [vmem:[#allocation2 + $0x3] sm:$0x1] %v1143_v44 }
 0x199   : > { %v926_v48 = vpop.f32.mrf.mxu0  ;;  %v996_v49 = vpop.f32.mrf.mxu1 }
 0x19a   : > { %v1144_v50 = vadd.f32 %v926_v48, %v448_v46  ;;  %v1145_v51 = vadd.f32 %v996_v49, %v449_v47 }
 0x19b   : > { %v1857_v52 = vpop.f32.mrf.mxu0  ;;  %v1892_v53 = vpop.f32.mrf.mxu1 }
 0x19c   : > { %1152 = vst [vmem:[#allocation2 + $0x4] sm:$0x1] %v1144_v50  ;;  %1153 = vst [vmem:[#allocation2 + $0x5] sm:$0x1] %v1145_v51 }
 0x1ba   : > { %1159 = sbr.rel (%p1540_p4) target bundleno = 1119 (0x45f), region = 64 }
 0x1bb   : > { %v1066_v56 = vpop.f32.mrf.mxu0  ;;  %v1136_v57 = vpop.f32.mrf.mxu1 }
 0x1bc   : > { %v1146_v58 = vadd.f32 %v1066_v56, %v450_v54  ;;  %v1147_v59 = vadd.f32 %v1136_v57, %v451_v55 }
 0x1bd   : > { %v1927_v60 = vpop.f32.mrf.mxu0  ;;  %v1962_v61 = vpop.f32.mrf.mxu1 }
 0x1be   : > { %1154 = vst [vmem:[#allocation2 + $0x6] sm:$0x1] %v1146_v58  ;;  %1155 = vst [vmem:[#allocation2 + $0x7] sm:$0x1] %v1147_v59 }
 0x1bf   : > { %v1168_v62 = vld [vmem:[%s2476_s18] sm:$0xff]  ;;  %v2269_v63 = vmov 0   ;;  %v1230_v1 = vld [vmem:[#allocation7] sm:$0xff]  ;;  %v2270_v2 = vmov 0.0   ;;  %vm2271_vm2 = vmmov 0   ;;  %v1176_v4 = vsub.s32 0, %v2506_v18 }
 0x1c0   : > { %2077 = vset.pattern.permute.xlu0 %v2269_v63  ;;  %v1169_v0 = vadd.f32 1e-10, %v1168_v62  ;;  %1963 = vmatprep.subr.mxu0 %v2270_v2  ;;  %v1180_v5 = vsub.s32 1, %v2506_v18  ;;  %v1184_v6 = vsub.s32 2, %v2506_v18  ;;  %v1188_v7 = vsub.s32 3, %v2506_v18 }
 0x1c1   : > { %1965 = vmatprep.mubr.msk.f32.mxu0 %vm2271_vm2, %v2270_v2  ;;  %1964 = vmatpush3.xpose.msra.mxu0 %v1230_v1  ;;  %v1192_v8 = vsub.s32 4, %v2506_v18  ;;  %v1196_v9 = vsub.s32 5, %v2506_v18  ;;  %v1200_v11 = vsub.s32 6, %v2506_v18  ;;  %v1204_v15 = vsub.s32 7, %v2506_v18  ;;  %v1160_v22 = vld [vmem:[#allocation2] sm:$0x1] }
 0x1c2   : > { %1172 = vperm.xlu0 %2077, %v1169_v0   ;;  %v1161_v23 = vld [vmem:[#allocation2 + $0x1] sm:$0x1]  ;;  %v1162_v25 = vld [vmem:[#allocation2 + $0x2] sm:$0x1]  ;;  %v1163_v28 = vld [vmem:[#allocation2 + $0x3] sm:$0x1] }
 0x1c3   : > { %v1164_v30 = vld [vmem:[#allocation2 + $0x4] sm:$0x1]  ;;  %v1165_v32 = vld [vmem:[#allocation2 + $0x5] sm:$0x1]  ;;  %v1541_v58 = vld [vmem:[#allocation8] ss:$0 sm:$0xff] }
 0x1c4   : > { %vm1366_vm3 = vcmask 64512  }
 0x1c5   : > { %v1166_v36 = vld [vmem:[#allocation2 + $0x6] sm:$0x1]  ;;  %v1167_v40 = vld [vmem:[#allocation2 + $0x7] sm:$0x1] }
 0x23d   : > { %v1173_v10 = vpop.permute.xlu0 %1172 }
 0x23e   : > { %v1177_v12 = vrot.slane %v1173_v10, %v1176_v4  ;;  %v1181_v13 = vrot.slane %v1173_v10, %v1180_v5  ;;  %v1185_v14 = vrot.slane %v1173_v10, %v1184_v6  ;;  %v1189_v16 = vrot.slane %v1173_v10, %v1188_v7 }
 0x23f   : > { %v1193_v17 = vrot.slane %v1173_v10, %v1192_v8  ;;  %v1197_v19 = vrot.slane %v1173_v10, %v1196_v9  ;;  %v1201_v20 = vrot.slane %v1173_v10, %v1200_v11  ;;  %v1205_v21 = vrot.slane %v1173_v10, %v1204_v15 }
 0x240   : > { %2078 = vrcp.f32 %v1177_v12 }
 0x241   : > { %2080 = vrcp.f32 %v1181_v13 }
 0x242   : > { %2082 = vrcp.f32 %v1185_v14 }
 0x243   : > { %2084 = vrcp.f32 %v1189_v16 }
 0x244   : > { %2086 = vrcp.f32 %v1193_v17 }
 0x245   : > { %2088 = vrcp.f32 %v1197_v19 }
 0x246   : > { %2090 = vrcp.f32 %v1201_v20 }
 0x247   : > { %2092 = vrcp.f32 %v1205_v21 }
 0x24d   : > { %v2079_v24 = vpop.eup %2078 }
 0x24e   : > { %v2081_v27 = vpop.eup %2080  ;;  %v1215_v18 = vmul.f32 %v2079_v24, %v1160_v22 }
 0x24f   : > { %v2083_v29 = vpop.eup %2082  ;;  %v1217_v31 = vmul.f32 %v2081_v27, %v1161_v23 }
 0x250   : > { %v2085_v33 = vpop.eup %2084  ;;  %v1219_v34 = vmul.f32 %v2083_v29, %v1162_v25 }
 0x251   : > { %v2087_v35 = vpop.eup %2086  ;;  %v1221_v37 = vmul.f32 %v2085_v33, %v1163_v28  ;;  %v1246_v38 = vcombine.low %v1215_v18, %v1217_v31 }
 0x252   : > { %v2089_v39 = vpop.eup %2088  ;;  %v1223_v41 = vmul.f32 %v2087_v35, %v1164_v30 }
 0x253   : > { %v2091_v42 = vpop.eup %2090  ;;  %v1225_v43 = vmul.f32 %v2089_v39, %v1165_v32  ;;  %v1247_v44 = vcombine.low %v1219_v34, %v1221_v37  ;;  %v1256_v45 = vrot.slane %v1246_v38, %v2519_v26 }
 0x254   : > { %v2093_v3 = vpop.eup %2092  ;;  %v1227_v46 = vmul.f32 %v2091_v42, %v1166_v36 }
 0x255   : > { %v1229_v47 = vmul.f32 %v2093_v3, %v1167_v40  ;;  %v1248_v48 = vcombine.low %v1223_v41, %v1225_v43  ;;  %v1263_v49 = vrot.slane %v1247_v44, %v2519_v26 }
 0x257   : > { %v1249_v50 = vcombine.low %v1227_v46, %v1229_v47  ;;  %v1270_v51 = vrot.slane %v1248_v48, %v2519_v26  ;;  %v1278_v52 = vcombine.low %v1256_v45, %v1263_v49 }
 0x259   : > { %v1277_v53 = vrot.slane %v1249_v50, %v2519_v26  ;;  %v1286_v55 = vrot.slane %v1278_v52, %v2519_v26 }
 0x25b   : > { %v1279_v54 = vcombine.low %v1270_v51, %v1277_v53 }
 0x25d   : > { %v1293_v56 = vrot.slane %v1279_v54, %v2519_v26 }
 0x25f   : > { %v1294_v57 = vcombine.low %v1286_v55, %v1293_v56 }
 0x261   : > { %1966 = vmatmul.mubr.f32.vlgmr.msra.gmra.mxu0 %v1294_v57 }
 0x321   : > { %v1362_v59 = vpop.f32.mrf.mxu0 }
 0x322   : > { %v1363_v60 = vadd.f32 %v1541_v58, %v1362_v59 }
 0x323   : > { %v1967_v61 = vpop.f32.mrf.mxu0 }
 0x324   : > { %v1367_v62 = vsel %vm1366_vm3, %v1363_v60, -inf }
 0x325   : > { %1368 = vmax.xlane.f32.xlu0 %v1367_v62 }
 0x3ae   : > { %v1369_v63 = vpop.xlane.xlu0 %1368 }
 0x3af   : > { %v1370_v0 = vsub.f32 %v1363_v60, %v1369_v63 }
 0x3b1   : > { %v1371_v1 = vmul.f32 1.442695, %v1370_v0 }
 0x3b3   : > { %2094 = vpow2.f32 %v1371_v1 }
 0x3c0   : > { %v2095_v2 = vpop.eup %2094 }
 0x3c1   : > { %v1373_v4 = vsel %vm1366_vm3, %v2095_v2, 0.0 }
 0x3c2   : > { %1374 = vadd.xlane.f32.xlu1 %v1373_v4 }
 0x44b   : > { %v1375_v26 = vpop.xlane.xlu1 %1374 }
 0x44c   : > { %2096 = vlog2.f32 %v1375_v26 }
 0x459   : > { %v2097_v5 = vpop.eup %2096 }
 0x45a   : > { %v1377_v6 = vmul.f32 0.6931472, %v2097_v5 }
 0x45c   : > { %v1378_v7 = vsub.f32 %v1370_v0, %v1377_v6 }
 0x45e   : > { %1379 = vst.msk [vmem:[%s2481_s27] sm:$0xff] %vm1366_vm3, %v1378_v7 }
 0x45f PF: > { %s22_s25 = sadd.s32 1, %s2254_s25   ;;  %s2861_s7 = sld [smem:[#allocation17_spill]] }
 0x460   : > { %p19_p3 = scmp.ge.s32.totalorder %s22_s25, 6   ;;  %s2862_s9 = sld [smem:[#allocation18_spill]] }
 0x461   : > { %s2863_s18 = smov %s2230_s19  ;;  %s2864_s19 = smov %s2234_s20 }
 0x462   : > { %s2865_s20 = smov %s2380_s12  ;;  %s2866_s21 = smov %s2246_s23 }
 0x463   : > { %s2867_s22 = smov %s2250_s24  ;;  %21 = sbr.rel (!%p19_p3) target bundleno = 11 (0xb), region = 117 }
 0x465   : > { %s2868_s23 = smov %s2861_s7 }
 0x466   : > { %s2869_s24 = smov %s2862_s9 }
 0x468   :  { %1399 = vsyncpa [#allocation4], 1 }
 0x469   :  { %1401 = vsyncpa [#allocation4 + $0x1], 1 }
 0x46a   :  { %1402 = vsyncpa [#allocation6], 1 }
 0x46b   :  { %1404 = vsyncpa [#allocation6 + $0x1], 1 }
 0x46c   :  { %1405 = vsyncpa [#allocation9], 1 }

</bundles_post_ra>
